<compile_context>
chip_gen: v6e
topology: v6e:2x2x1
jax: 0.10.0
libtpu: 0.0.40
codegen_flags: <defaults>
</compile_context>

<pallas_src>
import jax
import jax.numpy as jnp
from jax.experimental import pallas as pl
from jax.experimental.pallas import tpu as pltpu


def _round_up(v, m):
    return ((v + m - 1) // m) * m


# ------------------------------ Pallas kernel -------------------------------


def mish_kernel(x_ref, o_ref):
    """Elementwise mish on one (block_rows, lanes) VMEM tile.

    Single-transcendental reformulation: with t = exp(-|x|) (so t in (0, 1],
    never overflows),
        tanh(softplus(x)) = (1 + 2t) / (1 + 2t + 2t^2)   for x >= 0
                          = t(2 + t) / (2 + 2t + t^2)    for x <  0
    Only one exp hits the EUP; the rest is VPU work, keeping the kernel
    memory-bound on all of v5e/v6e/v7x.
    """
    x = x_ref[...].astype(jnp.float32)
    t = jnp.exp(-jnp.abs(x))
    t2 = t * t
    pos = x >= 0.0
    num = jnp.where(pos, 1.0 + 2.0 * t, t * (2.0 + t))
    den = jnp.where(pos, 1.0 + 2.0 * t + 2.0 * t2, 2.0 + 2.0 * t + t2)
    o_ref[...] = (x * (num / den)).astype(o_ref.dtype)


# ------------------------------ JAX wrapper ----------------------------------


def mish(x, *, target_block_bytes=4 << 20):
    """Elementwise mish on an array of any shape (NCHW in the LapSRN model)."""
    orig_shape = x.shape
    dtype = x.dtype
    n = x.size
    if n == 0:
        return x

    itemsize = jnp.dtype(dtype).itemsize
    # Native sublane tile: 8 for 4-byte, 16 for 2-byte, 32 for 1-byte dtypes.
    sublane = max(8, 32 // itemsize)

    # ---- choose lane width: prefer pad-free layout with sublane-aligned rows.
    lanes = None
    for cand in (1024, 512, 256, 128):
        if n % cand == 0 and (n // cand) % sublane == 0:
            lanes = cand
            break
    if lanes is None:
        for cand in (1024, 512, 256, 128):
            if n % cand == 0:
                lanes = cand
                break

    if lanes is not None:
        rows = n // lanes
        pad = 0
    else:
        # Rare fallback (n not a multiple of 128): minimal zero pad.
        # mish(0) == 0 so padding is harmless and is sliced off at the end.
        lanes = 128
        rows = pl.cdiv(n, lanes)
        pad = rows * lanes - n

    flat = jnp.ravel(x)
    if pad:
        flat = jnp.concatenate([flat, jnp.zeros((pad,), dtype)])
    x2d = flat.reshape(rows, lanes)

    # ---- choose block_rows: ~4 MiB blocks, sublane multiple, grid >= 2 when possible.
    target_rows = max(
        sublane, (target_block_bytes // (lanes * itemsize)) // sublane * sublane
    )
    if rows < sublane:
        # Tiny input: single full-array block (legal even when rows % sublane != 0).
        block_rows = rows
    else:
        # Cap at half the rows (rounded to sublane) so v7x's 2nd TensorCore gets work;
        # partial last blocks (rows % block_rows != 0) are handled by Pallas masking.
        half_rows = _round_up(pl.cdiv(rows, 2), sublane)
        block_rows = min(target_rows, half_rows)

    grid = (pl.cdiv(rows, block_rows),)

    out2d = pl.pallas_call(
        mish_kernel,
        out_shape=jax.ShapeDtypeStruct((rows, lanes), dtype),
        grid=grid,
        in_specs=[pl.BlockSpec((block_rows, lanes), lambda i: (i, 0))],
        out_specs=pl.BlockSpec((block_rows, lanes), lambda i: (i, 0)),
        compiler_params=pltpu.CompilerParams(
            dimension_semantics=("parallel",),
            # Double-buffered in+out at 4 MiB/block = 16 MiB; raise v5e's 16 MiB
            # default scoped VMEM while staying within v7x's 32 MiB default.
            vmem_limit_bytes=32 << 20,
        ),
    )(x2d)

    out_flat = out2d.reshape(-1)
    if pad:
        out_flat = out_flat[:n]
    return out_flat.reshape(orig_shape)


# ---------------------------- pure-JAX reference -----------------------------


def ref_mish(x):
    return x * jnp.tanh(jax.nn.softplus(x))


# --------------------------------- main --------------------------------------


if __name__ == "__main__":
    B, C, H, W = 2, 4, 16, 16

    key = jax.random.PRNGKey(0)
    x = jax.random.normal(key, (B, C, H, W), jnp.float32) * 3.0

    out = jax.block_until_ready(jax.jit(mish)(x))
    assert out.shape == (B, C, H, W), out.shape

    ref = jax.block_until_ready(ref_mish(x))
    max_diff = float(jnp.max(jnp.abs(out - ref)))
    assert max_diff < 1e-5, f"mismatch vs reference: {max_diff}"

    # Also exercise the padding / partial-block fallback (size not a multiple of 128).
    x_odd = jax.random.normal(jax.random.PRNGKey(1), (3, 5, 7, 11), jnp.float32) * 3.0
    out_odd = jax.block_until_ready(jax.jit(mish)(x_odd))
    max_diff_odd = float(jnp.max(jnp.abs(out_odd - ref_mish(x_odd))))
    assert max_diff_odd < 1e-5, f"mismatch (odd shape) vs reference: {max_diff_odd}"

    print("KERNEL_OK")
</pallas_src>

<mosaic_0001>
module attributes {stable_mosaic.version = 11 : i64} {
  func.func @mish_kernel(%arg0: i32, %arg1: memref<8x256xf32, #tpu.memory_space<vmem>>, %arg2: memref<8x256xf32, #tpu.memory_space<vmem>>) attributes {dimension_semantics = [#tpu.dimension_semantics<parallel>], iteration_bounds = array<i64: 1>, scalar_prefetch = 0 : i64, scratch_operands = 0 : i64, tpu.core_type = #tpu.core_type<tc>, window_params = [{transform_indices = @transform_0, window_bounds = array<i64: 8, 256>}, {transform_indices = @transform_1, window_bounds = array<i64: 8, 256>}]} {
    %c0 = arith.constant 0 : index
    %c0_0 = arith.constant 0 : index
    %0 = vector.load %arg1[%c0, %c0_0] : memref<8x256xf32, #tpu.memory_space<vmem>>, vector<8x256xf32>
    %1 = math.absf %0 : vector<8x256xf32>
    %cst = arith.constant 0.000000e+00 : f32
    %2 = vector.broadcast %cst : f32 to vector<8x256xf32>
    %3 = arith.subf %2, %1 : vector<8x256xf32>
    %4 = math.exp %3 : vector<8x256xf32>
    %5 = arith.mulf %4, %4 : vector<8x256xf32>
    %cst_1 = arith.constant 0.000000e+00 : f32
    %6 = vector.broadcast %cst_1 : f32 to vector<8x256xf32>
    %7 = arith.cmpf oge, %0, %6 : vector<8x256xf32>
    %cst_2 = arith.constant 2.000000e+00 : f32
    %8 = vector.broadcast %cst_2 : f32 to vector<8x256xf32>
    %9 = arith.mulf %8, %4 : vector<8x256xf32>
    %cst_3 = arith.constant 1.000000e+00 : f32
    %10 = vector.broadcast %cst_3 : f32 to vector<8x256xf32>
    %11 = arith.addf %10, %9 : vector<8x256xf32>
    %cst_4 = arith.constant 2.000000e+00 : f32
    %12 = vector.broadcast %cst_4 : f32 to vector<8x256xf32>
    %13 = arith.addf %12, %4 : vector<8x256xf32>
    %14 = arith.mulf %4, %13 : vector<8x256xf32>
    %15 = arith.select %7, %11, %14 : vector<8x256xi1>, vector<8x256xf32>
    %cst_5 = arith.constant 2.000000e+00 : f32
    %16 = vector.broadcast %cst_5 : f32 to vector<8x256xf32>
    %17 = arith.mulf %16, %4 : vector<8x256xf32>
    %cst_6 = arith.constant 1.000000e+00 : f32
    %18 = vector.broadcast %cst_6 : f32 to vector<8x256xf32>
    %19 = arith.addf %18, %17 : vector<8x256xf32>
    %cst_7 = arith.constant 2.000000e+00 : f32
    %20 = vector.broadcast %cst_7 : f32 to vector<8x256xf32>
    %21 = arith.mulf %20, %5 : vector<8x256xf32>
    %22 = arith.addf %19, %21 : vector<8x256xf32>
    %cst_8 = arith.constant 2.000000e+00 : f32
    %23 = vector.broadcast %cst_8 : f32 to vector<8x256xf32>
    %24 = arith.mulf %23, %4 : vector<8x256xf32>
    %cst_9 = arith.constant 2.000000e+00 : f32
    %25 = vector.broadcast %cst_9 : f32 to vector<8x256xf32>
    %26 = arith.addf %25, %24 : vector<8x256xf32>
    %27 = arith.addf %26, %5 : vector<8x256xf32>
    %28 = arith.select %7, %22, %27 : vector<8x256xi1>, vector<8x256xf32>
    %29 = arith.divf %15, %28 : vector<8x256xf32>
    %30 = arith.mulf %0, %29 : vector<8x256xf32>
    %c0_10 = arith.constant 0 : index
    %c0_11 = arith.constant 0 : index
    %31 = vector.load %arg2[%c0_10, %c0_11] : memref<8x256xf32, #tpu.memory_space<vmem>>, vector<8x256xf32>
    tpu.vector_store %arg2[%c0_10, %c0_11], %30 {strides = array<i32>} : memref<8x256xf32, #tpu.memory_space<vmem>>, vector<8x256xf32>,
    return
  }
  func.func @transform_0(%arg0: i32) -> (i32, i32) {
    %c0_i32 = arith.constant 0 : i32
    %c0_i32_0 = arith.constant 0 : i32
    return %arg0, %c0_i32 : i32, i32
  }
  func.func @transform_1(%arg0: i32) -> (i32, i32) {
    %c0_i32 = arith.constant 0 : i32
    %c0_i32_0 = arith.constant 0 : i32
    return %arg0, %c0_i32 : i32, i32
  }
}

</mosaic_0001>

<bundles_post_ra>
// kernel: mish.1
= control target key start
LH: loop header
LB: loop body
LE: loop exit
PB: predicated region body
PF: predicated region fallthrough
CT: control target
= control target key end

     0   :  { %s86_s0 = inlined_call_operand.vmem [shape: f32[8,256], index: 0, kind: input, shape index: {}]   ;;  %s87_s1 = inlined_call_operand.vmem [shape: f32[8,256], index: 1, kind: output, shape index: {}]  }
   0x1   :  { %v8_v0 = vld [vmem:[%s86_s0] sm:$0xff]  ;;  %v9_v1 = vld [vmem:[%s86_s0 + $0x8] sm:$0xff] }
   0x2   :  { %v10_v2 = vand.u32 2147483647, %v8_v0  ;;  %v11_v3 = vand.u32 2147483647, %v9_v1  ;;  %vm20_vm0 = vcmp.ge.f32.partialorder %v8_v0, 0.0  ;;  %vm21_vm1 = vcmp.ge.f32.partialorder %v9_v1, 0.0 }
   0x4   :  { %v12_v4 = vsub.f32 0.0, %v10_v2  ;;  %v13_v5 = vsub.f32 0.0, %v11_v3 }
   0x6   :  { %v14_v6 = vmul.f32 1.442695, %v12_v4  ;;  %v16_v7 = vmul.f32 1.442695, %v13_v5 }
   0x8   :  { %54 = vpow2.f32 %v14_v6 }
   0x9   :  { %56 = vpow2.f32 %v16_v7 }
  0x15   :  { %v55_v8 = vpop.eup %54 }
  0x16   :  { %v57_v9 = vpop.eup %56  ;;  %v18_v10 = vmul.f32 %v55_v8, %v55_v8  ;;  %v22_v11 = vmul.f32 2.0, %v55_v8  ;;  %v26_v26 = vadd.f32 2.0, %v55_v8 }
  0x17   :  { %v19_v12 = vmul.f32 %v57_v9, %v57_v9  ;;  %v23_v13 = vmul.f32 2.0, %v57_v9  ;;  %v27_v27 = vadd.f32 2.0, %v57_v9 }
  0x18   :  { %v24_v14 = vadd.f32 1.0, %v22_v11  ;;  %v32_v15 = vmul.f32 2.0, %v18_v10  ;;  %v36_v16 = vadd.f32 2.0, %v22_v11  ;;  %v28_v28 = vmul.f32 %v55_v8, %v26_v26 }
  0x19   :  { %v25_v17 = vadd.f32 1.0, %v23_v13  ;;  %v33_v18 = vmul.f32 2.0, %v19_v12  ;;  %v37_v19 = vadd.f32 2.0, %v23_v13  ;;  %v29_v29 = vmul.f32 %v57_v9, %v27_v27 }
  0x1a   :  { %v34_v20 = vadd.f32 %v32_v15, %v24_v14  ;;  %v38_v21 = vadd.f32 %v36_v16, %v18_v10  ;;  %v30_v30 = vsel %vm20_vm0, %v24_v14, %v28_v28 }
  0x1b   :  { %v35_v22 = vadd.f32 %v33_v18, %v25_v17  ;;  %v39_v23 = vadd.f32 %v37_v19, %v19_v12  ;;  %v31_v31 = vsel %vm21_vm1, %v25_v17, %v29_v29 }
  0x1c   :  { %v40_v24 = vsel %vm20_vm0, %v34_v20, %v38_v21 }
  0x1d   :  { %58 = vrcp.f32 %v40_v24  ;;  %v41_v25 = vsel %vm21_vm1, %v35_v22, %v39_v23 }
  0x1e   :  { %60 = vrcp.f32 %v41_v25 }
  0x2a   :  { %v59_v32 = vpop.eup %58 }
  0x2b   :  { %v61_v33 = vpop.eup %60  ;;  %v43_v34 = vmul.f32 %v59_v32, %v30_v30 }
  0x2c   :  { %v45_v35 = vmul.f32 %v61_v33, %v31_v31 }
  0x2d   :  { %v46_v36 = vmul.f32 %v43_v34, %v8_v0 }
  0x2e   :  { %v47_v37 = vmul.f32 %v45_v35, %v9_v1 }
  0x2f   :  { %48 = vst [vmem:[%s87_s1] sm:$0xff] %v46_v36 }
  0x30   :  { %49 = vst [vmem:[%s87_s1 + $0x8] sm:$0xff] %v47_v37 }

</bundles_post_ra>
